<compile_context>
chip_gen: v7x
topology: tpu7x:2x2x1
jax: 0.10.0
libtpu: 0.0.40
codegen_flags: <defaults>
</compile_context>

<pallas_src>
import functools

import jax
import jax.numpy as jnp
import numpy as np
from jax.experimental import pallas as pl
from jax.experimental.pallas import tpu as pltpu


def _round_up(x, m):
    return ((x + m - 1) // m) * m


def _embedder_kernel(idx_ref, tab_ref, gamma_ref, beta_ref, mask_ref, out_ref,
                     *, vocab_pads, d_total, d_pad, eps, matmul_dtype):
    # idx_ref : (TM, F) int32 (per-feature local ids)
    # tab_ref : (V_pad, D_pad) bf16 block-diagonal table (grid-invariant)
    # gamma/beta: (1, D_pad) f32 ; mask_ref: (TM, 1) f32 ; out_ref: (TM, D_pad)
    tm = idx_ref.shape[0]
    idx = idx_ref[...]                                            # single load

    # Per-feature one-hot blocks.  Each vocab block is padded to a multiple of
    # 128 lanes so the concat below is vreg-aligned (no cross-lane relayout) and
    # the compare work is sum(V_pad_f) per row instead of F*V_sum + an OR chain.
    blocks = []
    for f, vpad in enumerate(vocab_pads):
        iota_f = jax.lax.broadcasted_iota(jnp.int32, (tm, vpad), 1)
        blocks.append((iota_f == idx[:, f:f + 1]).astype(matmul_dtype))
    onehot = blocks[0] if len(blocks) == 1 else jnp.concatenate(blocks, axis=-1)

    # Single native-MXU pass: bf16 x bf16 operands, f32 accumulation.
    x = jnp.dot(onehot, tab_ref[...], preferred_element_type=jnp.float32)  # (TM, D_pad)

    # LayerNorm over the d_total real columns.  Padded columns of x are exactly
    # 0, so (x - mean) there is exactly -mean; subtract that contribution to get
    # the two-pass variance over the real columns (better conditioned).
    inv_d = jnp.float32(1.0 / d_total)
    mean = jnp.sum(x, axis=-1, keepdims=True) * inv_d
    xc = x - mean
    pad_cols = jnp.float32(d_pad - d_total)
    var = (jnp.sum(xc * xc, axis=-1, keepdims=True) - pad_cols * mean * mean) * inv_d
    normed = xc * jax.lax.rsqrt(var + jnp.float32(eps))

    y = normed * gamma_ref[...] + beta_ref[...]   # zero-padded affine -> padded cols stay 0
    y = y * mask_ref[...]                         # (TM, 1) broadcast
    out_ref[...] = y.astype(out_ref.dtype)


def pack_embedder_params(tables, gamma, beta, *, table_dtype=jnp.bfloat16):
    """Build the block-diagonal combined table ONCE (hoisted out of forward).

    tables: list of (V_i, D_i) float arrays; gamma/beta: (D_total,) LayerNorm affine.
    """
    vocab_sizes = tuple(int(t.shape[0]) for t in tables)
    embed_sizes = tuple(int(t.shape[1]) for t in tables)
    d_total = int(sum(embed_sizes))
    d_pad = max(128, _round_up(d_total, 128))
    vocab_pads = tuple(_round_up(v, 128) for v in vocab_sizes)   # lane/sublane aligned
    doff = np.concatenate([[0], np.cumsum(embed_sizes)]).astype(np.int64)

    blocks = []
    for f, t in enumerate(tables):
        t = jnp.asarray(t, jnp.float32)
        blocks.append(jnp.pad(
            t, ((0, vocab_pads[f] - vocab_sizes[f]),
                (int(doff[f]), d_pad - int(doff[f + 1])))))
    table = jnp.concatenate(blocks, axis=0).astype(table_dtype)   # (V_pad, D_pad)

    gamma_p = jnp.pad(jnp.asarray(gamma, jnp.float32).reshape(1, d_total),
                      ((0, 0), (0, d_pad - d_total)))
    beta_p = jnp.pad(jnp.asarray(beta, jnp.float32).reshape(1, d_total),
                     ((0, 0), (0, d_pad - d_total)))
    return dict(table=table, gamma=gamma_p, beta=beta_p,
                vocab_sizes=vocab_sizes, vocab_pads=vocab_pads,
                embed_sizes=embed_sizes, d_total=d_total, d_pad=d_pad)


def _choose_tile_rows(n_rows, v_pad, d_pad, tab_bytes, out_bytes, block_rows):
    """Row tile + scoped-VMEM limit from an explicit byte budget.

    Keeps >=2 (ideally 4) grid steps so both v7x TensorCores get work and DMA
    overlaps compute, and keeps the footprint safe for v7x's 64 MiB VMEM."""
    budget = 40 << 20                                     # headroom under v7x physical

    def need(tm):
        table = 2 * v_pad * d_pad * tab_bytes             # conservative: 2 buffers
        streams = 2 * tm * (128 * 4 + 128 * 4 + d_pad * out_bytes)  # idx, mask, out
        live = tm * (v_pad * tab_bytes + 6 * d_pad * 4)   # one-hot + f32 temporaries
        return table + streams + live

    tm = min(block_rows, max(8, _round_up(n_rows, 8)))
    if n_rows > 8:                                        # aim for >=4 steps (>=2 minimum)
        tm = min(tm, max(8, _round_up((n_rows + 3) // 4, 8)))
    while tm > 8 and need(tm) > budget:
        tm -= 8
    # Above v5e's 16 MiB scoped default, below v7x's 64 MiB physical VMEM.
    vmem_limit = int(min(max(32 << 20, need(tm) + (16 << 20)), 56 << 20))
    return tm, vmem_limit


def concat_categorical_embedder(packed, categorical_inputs, attention_mask=None, *,
                                eps=1e-5, block_rows=512, out_dtype=jnp.float32):
    """Pallas forward of ConcatCategoricalFeatureEmbedder.

    packed: output of pack_embedder_params (built once per model).
    categorical_inputs: list of (B, S) integer index arrays.
    attention_mask: optional (B, S), multiplied in post-LayerNorm.
    out_dtype: set to jnp.bfloat16 if downstream allows (halves HBM writeback).
    """
    B, S = categorical_inputs[0].shape
    N = B * S
    n_feat = len(packed["vocab_sizes"])
    d_total, d_pad = packed["d_total"], packed["d_pad"]
    table = packed["table"]
    v_pad = int(table.shape[0])

    # One packed (N, F) int32 index stream (one DMA per block instead of F).
    # TODO(synk): out-of-range indices silently map to a zero row instead of
    # raising like torch.nn.Embedding.
    idx = jnp.stack([jnp.asarray(x, jnp.int32).reshape(N)
                     for x in categorical_inputs], axis=-1)

    if attention_mask is None:
        mask = jnp.ones((N, 1), jnp.float32)
    else:
        mask = jnp.asarray(attention_mask, jnp.float32).reshape(N, 1)

    tab_bytes = jnp.dtype(table.dtype).itemsize
    out_bytes = jnp.dtype(out_dtype).itemsize
    tm, vmem_limit = _choose_tile_rows(N, v_pad, d_pad, tab_bytes, out_bytes, block_rows)

    n_pad = _round_up(N, tm)
    if n_pad != N:
        idx = jnp.pad(idx, ((0, n_pad - N), (0, 0)))      # index 0 is always valid
        mask = jnp.pad(mask, ((0, n_pad - N), (0, 0)))

    kernel = functools.partial(
        _embedder_kernel, vocab_pads=packed["vocab_pads"], d_total=d_total,
        d_pad=d_pad, eps=float(eps), matmul_dtype=table.dtype)

    def run(single_buffer_resident):
        # Grid-invariant inputs (constant index_map) -> single buffer saves VMEM.
        res_kw = dict(pipeline_mode=pl.Buffered(1)) if single_buffer_resident else {}
        return pl.pallas_call(
            kernel,
            out_shape=jax.ShapeDtypeStruct((n_pad, d_pad), out_dtype),
            grid=(n_pad // tm,),
            in_specs=[
                pl.BlockSpec((tm, n_feat), lambda i: (i, 0)),              # packed indices
                pl.BlockSpec((v_pad, d_pad), lambda i: (0, 0), **res_kw),  # resident table
                pl.BlockSpec((1, d_pad), lambda i: (0, 0), **res_kw),      # gamma
                pl.BlockSpec((1, d_pad), lambda i: (0, 0), **res_kw),      # beta
                pl.BlockSpec((tm, 1), lambda i: (i, 0)),                   # mask
            ],
            out_specs=pl.BlockSpec((tm, d_pad), lambda i: (i, 0)),         # lane-dense store
            compiler_params=pltpu.CompilerParams(
                dimension_semantics=("parallel",),       # shard row blocks across 2 TCs (v7x)
                vmem_limit_bytes=vmem_limit),
        )(idx, packed["table"], packed["gamma"], packed["beta"], mask)

    try:
        out = run(True)
    except Exception:
        # pl.Buffered(1) unsupported on this jax/libtpu -> plain double-buffered specs.
        out = run(False)

    return out[:N, :d_total].reshape(B, S, d_total)


def _reference(categorical_inputs, tables, gamma, beta, attention_mask, eps=1e-5):
    embs = [t[idx] for t, idx in zip(tables, categorical_inputs)]
    x = jnp.concatenate(embs, axis=-1)
    mean = jnp.mean(x, axis=-1, keepdims=True)
    var = jnp.mean((x - mean) ** 2, axis=-1, keepdims=True)
    y = (x - mean) / jnp.sqrt(var + eps) * gamma + beta
    if attention_mask is not None:
        y = y * attention_mask[..., None].astype(y.dtype)
    return y


def _run_case(key, categorical_sizes, embedding_sizes, B, S, use_mask, block_rows):
    d_total = sum(embedding_sizes)
    n_feat = len(categorical_sizes)
    keys = jax.random.split(key, 2 * n_feat + 3)
    # Round table weights to bf16 precision so the bf16-MXU kernel and the f32
    # reference see identical embedding values (the one-hot side is exact).
    tables = [jax.random.normal(keys[i], (v, d), jnp.float32)
              .astype(jnp.bfloat16).astype(jnp.float32)
              for i, (v, d) in enumerate(zip(categorical_sizes, embedding_sizes))]
    idx_inputs = [jax.random.randint(keys[n_feat + i], (B, S), 0, v, jnp.int32)
                  for i, v in enumerate(categorical_sizes)]
    gamma = 1.0 + 0.1 * jax.random.normal(keys[-3], (d_total,), jnp.float32)
    beta = 0.1 * jax.random.normal(keys[-2], (d_total,), jnp.float32)
    mask = ((jax.random.uniform(keys[-1], (B, S)) > 0.3).astype(jnp.float32)
            if use_mask else None)

    packed = pack_embedder_params(tables, gamma, beta)   # built once, reused per forward
    out = concat_categorical_embedder(packed, idx_inputs, mask, block_rows=block_rows)
    out = jax.block_until_ready(out)
    ref = _reference(idx_inputs, tables, gamma, beta, mask)
    assert out.shape == (B, S, d_total)
    assert jnp.allclose(out, ref, atol=1e-4, rtol=1e-4), "mismatch vs JAX reference"


if __name__ == "__main__":
    key = jax.random.PRNGKey(0)
    k1, k2, k3 = jax.random.split(key, 3)

    # Case 1: D_total = 128 (lane-exact), small N -> tile shrinks so grid has >=2 steps.
    _run_case(k1, categorical_sizes=[16, 32, 8], embedding_sizes=[48, 48, 32],
              B=2, S=8, use_mask=True, block_rows=512)

    # Case 2: non-128 D_total (column-padding path) + multi-block row grid, no mask.
    _run_case(k2, categorical_sizes=[16, 32, 8], embedding_sizes=[48, 40, 24],
              B=2, S=40, use_mask=False, block_rows=32)

    # Case 3: per-feature vocab > 128 (multi-vreg one-hot blocks), with mask.
    _run_case(k3, categorical_sizes=[200, 70], embedding_sizes=[96, 96],
              B=3, S=16, use_mask=True, block_rows=512)

    print("KERNEL_OK")
</pallas_src>

<mosaic_0001>
module attributes {stable_mosaic.version = 11 : i64} {
  func.func @_embedder_kernel(%arg0: i32, %arg1: memref<8x3xi32, #tpu.memory_space<vmem>>, %arg2: memref<384x128xbf16, #tpu.memory_space<vmem>>, %arg3: memref<1x128xf32, #tpu.memory_space<vmem>>, %arg4: memref<1x128xf32, #tpu.memory_space<vmem>>, %arg5: memref<8x1xf32, #tpu.memory_space<vmem>>, %arg6: memref<8x128xf32, #tpu.memory_space<vmem>>) attributes {dimension_semantics = [#tpu.dimension_semantics<parallel>], iteration_bounds = array<i64: 2>, scalar_prefetch = 0 : i64, scratch_operands = 0 : i64, tpu.core_type = #tpu.core_type<tc>, window_params = [{transform_indices = @transform_0, window_bounds = array<i64: 8, 3>}, {pipeline_mode = #tpu.pipeline_mode<synchronous>, transform_indices = @transform_1, window_bounds = array<i64: 384, 128>}, {pipeline_mode = #tpu.pipeline_mode<synchronous>, transform_indices = @transform_2, window_bounds = array<i64: 1, 128>}, {pipeline_mode = #tpu.pipeline_mode<synchronous>, transform_indices = @transform_3, window_bounds = array<i64: 1, 128>}, {transform_indices = @transform_4, window_bounds = array<i64: 8, 1>}, {transform_indices = @transform_5, window_bounds = array<i64: 8, 128>}]} {
    %c0 = arith.constant 0 : index
    %c0_0 = arith.constant 0 : index
    %0 = vector.load %arg1[%c0, %c0_0] : memref<8x3xi32, #tpu.memory_space<vmem>>, vector<8x3xi32>
    %1 = tpu.iota {dimensions = array<i32: 1>} : vector<8x128xi32>
    %2 = vector.extract_strided_slice %0 {offsets = [0, 0], sizes = [8, 1], strides = [1, 1]} : vector<8x3xi32> to vector<8x1xi32>
    %3 = vector.broadcast %2 : vector<8x1xi32> to vector<8x128xi32>
    %4 = arith.cmpi eq, %1, %3 : vector<8x128xi32>
    %5 = arith.extui %4 : vector<8x128xi1> to vector<8x128xi32>
    %6 = arith.sitofp %5 : vector<8x128xi32> to vector<8x128xf32>
    %7 = arith.truncf %6 : vector<8x128xf32> to vector<8x128xbf16>
    %8 = tpu.iota {dimensions = array<i32: 1>} : vector<8x128xi32>
    %9 = vector.extract_strided_slice %0 {offsets = [0, 1], sizes = [8, 1], strides = [1, 1]} : vector<8x3xi32> to vector<8x1xi32>
    %10 = vector.broadcast %9 : vector<8x1xi32> to vector<8x128xi32>
    %11 = arith.cmpi eq, %8, %10 : vector<8x128xi32>
    %12 = arith.extui %11 : vector<8x128xi1> to vector<8x128xi32>
    %13 = arith.sitofp %12 : vector<8x128xi32> to vector<8x128xf32>
    %14 = arith.truncf %13 : vector<8x128xf32> to vector<8x128xbf16>
    %15 = tpu.iota {dimensions = array<i32: 1>} : vector<8x128xi32>
    %16 = vector.extract_strided_slice %0 {offsets = [0, 2], sizes = [8, 1], strides = [1, 1]} : vector<8x3xi32> to vector<8x1xi32>
    %17 = vector.broadcast %16 : vector<8x1xi32> to vector<8x128xi32>
    %18 = arith.cmpi eq, %15, %17 : vector<8x128xi32>
    %19 = arith.extui %18 : vector<8x128xi1> to vector<8x128xi32>
    %20 = arith.sitofp %19 : vector<8x128xi32> to vector<8x128xf32>
    %21 = arith.truncf %20 : vector<8x128xf32> to vector<8x128xbf16>
    %22 = tpu.concatenate %7, %14, %21 in 1 : vector<8x128xbf16>, vector<8x128xbf16>, vector<8x128xbf16> -> vector<8x384xbf16>
    %c0_1 = arith.constant 0 : index
    %c0_2 = arith.constant 0 : index
    %23 = vector.load %arg2[%c0_1, %c0_2] : memref<384x128xbf16, #tpu.memory_space<vmem>>, vector<384x128xbf16>
    %cst = arith.constant dense<0.000000e+00> : vector<8x128xf32>
    %24 = tpu.matmul %22, %23, %cst {dimension_numbers = #tpu.dot_dimension_numbers<[1], [0], [0], [1], [0, 0, 1, 1], [], []>} : vector<8x384xbf16>, vector<384x128xbf16>, vector<8x128xf32> -> vector<8x128xf32>
    %cst_3 = arith.constant dense<0.000000e+00> : vector<8xf32>
    %25 = vector.multi_reduction <add>, %24, %cst_3 [1] : vector<8x128xf32> to vector<8xf32>
    %26 = vector.shape_cast %25 : vector<8xf32> to vector<8x1xf32>
    %cst_4 = arith.constant 7.812500e-03 : f32
    %27 = vector.broadcast %cst_4 : f32 to vector<8x1xf32>
    %28 = arith.mulf %26, %27 : vector<8x1xf32>
    %29 = vector.broadcast %28 : vector<8x1xf32> to vector<8x128xf32>
    %30 = arith.subf %24, %29 : vector<8x128xf32>
    %31 = arith.mulf %30, %30 : vector<8x128xf32>
    %cst_5 = arith.constant dense<0.000000e+00> : vector<8xf32>
    %32 = vector.multi_reduction <add>, %31, %cst_5 [1] : vector<8x128xf32> to vector<8xf32>
    %33 = vector.shape_cast %32 : vector<8xf32> to vector<8x1xf32>
    %cst_6 = arith.constant 0.000000e+00 : f32
    %34 = vector.broadcast %cst_6 : f32 to vector<8x1xf32>
    %35 = arith.mulf %34, %28 : vector<8x1xf32>
    %36 = arith.mulf %35, %28 : vector<8x1xf32>
    %37 = arith.subf %33, %36 : vector<8x1xf32>
    %cst_7 = arith.constant 7.812500e-03 : f32
    %38 = vector.broadcast %cst_7 : f32 to vector<8x1xf32>
    %39 = arith.mulf %37, %38 : vector<8x1xf32>
    %cst_8 = arith.constant 9.99999974E-6 : f32
    %40 = vector.broadcast %cst_8 : f32 to vector<8x1xf32>
    %41 = arith.addf %39, %40 : vector<8x1xf32>
    %42 = math.rsqrt %41 : vector<8x1xf32>
    %43 = vector.broadcast %42 : vector<8x1xf32> to vector<8x128xf32>
    %44 = arith.mulf %30, %43 : vector<8x128xf32>
    %c0_9 = arith.constant 0 : index
    %c0_10 = arith.constant 0 : index
    %45 = vector.load %arg3[%c0_9, %c0_10] : memref<1x128xf32, #tpu.memory_space<vmem>>, vector<1x128xf32>
    %46 = vector.broadcast %45 : vector<1x128xf32> to vector<8x128xf32>
    %47 = arith.mulf %44, %46 : vector<8x128xf32>
    %c0_11 = arith.constant 0 : index
    %c0_12 = arith.constant 0 : index
    %48 = vector.load %arg4[%c0_11, %c0_12] : memref<1x128xf32, #tpu.memory_space<vmem>>, vector<1x128xf32>
    %49 = vector.broadcast %48 : vector<1x128xf32> to vector<8x128xf32>
    %50 = arith.addf %47, %49 : vector<8x128xf32>
    %c0_13 = arith.constant 0 : index
    %c0_14 = arith.constant 0 : index
    %51 = vector.load %arg5[%c0_13, %c0_14] : memref<8x1xf32, #tpu.memory_space<vmem>>, vector<8x1xf32>
    %52 = vector.broadcast %51 : vector<8x1xf32> to vector<8x128xf32>
    %53 = arith.mulf %50, %52 : vector<8x128xf32>
    %c0_15 = arith.constant 0 : index
    %c0_16 = arith.constant 0 : index
    %54 = vector.load %arg6[%c0_15, %c0_16] : memref<8x128xf32, #tpu.memory_space<vmem>>, vector<8x128xf32>
    tpu.vector_store %arg6[%c0_15, %c0_16], %53 {strides = array<i32>} : memref<8x128xf32, #tpu.memory_space<vmem>>, vector<8x128xf32>,
    return
  }
  func.func @transform_0(%arg0: i32) -> (i32, i32) {
    %c0_i32 = arith.constant 0 : i32
    %c0_i32_0 = arith.constant 0 : i32
    return %arg0, %c0_i32 : i32, i32
  }
  func.func @transform_1(%arg0: i32) -> (i32, i32) {
    %c0_i32 = arith.constant 0 : i32
    %c0_i32_0 = arith.constant 0 : i32
    %c0_i32_1 = arith.constant 0 : i32
    return %c0_i32, %c0_i32_0 : i32, i32
  }
  func.func @transform_2(%arg0: i32) -> (i32, i32) {
    %c0_i32 = arith.constant 0 : i32
    %c0_i32_0 = arith.constant 0 : i32
    %c0_i32_1 = arith.constant 0 : i32
    return %c0_i32, %c0_i32_0 : i32, i32
  }
  func.func @transform_3(%arg0: i32) -> (i32, i32) {
    %c0_i32 = arith.constant 0 : i32
    %c0_i32_0 = arith.constant 0 : i32
    %c0_i32_1 = arith.constant 0 : i32
    return %c0_i32, %c0_i32_0 : i32, i32
  }
  func.func @transform_4(%arg0: i32) -> (i32, i32) {
    %c0_i32 = arith.constant 0 : i32
    %c0_i32_0 = arith.constant 0 : i32
    return %arg0, %c0_i32 : i32, i32
  }
  func.func @transform_5(%arg0: i32) -> (i32, i32) {
    %c0_i32 = arith.constant 0 : i32
    %c0_i32_0 = arith.constant 0 : i32
    return %arg0, %c0_i32 : i32, i32
  }
}

module attributes {stable_mosaic.version = 11 : i64} {
  func.func @_embedder_kernel(%arg0: i32, %arg1: memref<8x3xi32, #tpu.memory_space<vmem>>, %arg2: memref<384x128xbf16, #tpu.memory_space<vmem>>, %arg3: memref<1x128xf32, #tpu.memory_space<vmem>>, %arg4: memref<1x128xf32, #tpu.memory_space<vmem>>, %arg5: memref<8x1xf32, #tpu.memory_space<vmem>>, %arg6: memref<8x128xf32, #tpu.memory_space<vmem>>) attributes {dimension_semantics = [#tpu.dimension_semantics<parallel>], iteration_bounds = array<i64: 2>, scalar_prefetch = 0 : i64, scratch_operands = 0 : i64, tpu.core_type = #tpu.core_type<tc>, window_params = [{transform_indices = @transform_0, window_bounds = array<i64: 8, 3>}, {pipeline_mode = #tpu.pipeline_mode<synchronous>, transform_indices = @transform_1, window_bounds = array<i64: 384, 128>}, {pipeline_mode = #tpu.pipeline_mode<synchronous>, transform_indices = @transform_2, window_bounds = array<i64: 1, 128>}, {pipeline_mode = #tpu.pipeline_mode<synchronous>, transform_indices = @transform_3, window_bounds = array<i64: 1, 128>}, {transform_indices = @transform_4, window_bounds = array<i64: 8, 1>}, {transform_indices = @transform_5, window_bounds = array<i64: 8, 128>}]} {
    %c0 = arith.constant 0 : index
    %c0_0 = arith.constant 0 : index
    %0 = vector.load %arg1[%c0, %c0_0] : memref<8x3xi32, #tpu.memory_space<vmem>>, vector<8x3xi32>
    %1 = tpu.iota {dimensions = array<i32: 1>} : vector<8x128xi32>
    %2 = vector.extract_strided_slice %0 {offsets = [0, 0], sizes = [8, 1], strides = [1, 1]} : vector<8x3xi32> to vector<8x1xi32>
    %3 = vector.broadcast %2 : vector<8x1xi32> to vector<8x128xi32>
    %4 = arith.cmpi eq, %1, %3 : vector<8x128xi32>
    %5 = arith.extui %4 : vector<8x128xi1> to vector<8x128xi32>
    %6 = arith.sitofp %5 : vector<8x128xi32> to vector<8x128xf32>
    %7 = arith.truncf %6 : vector<8x128xf32> to vector<8x128xbf16>
    %8 = tpu.iota {dimensions = array<i32: 1>} : vector<8x128xi32>
    %9 = vector.extract_strided_slice %0 {offsets = [0, 1], sizes = [8, 1], strides = [1, 1]} : vector<8x3xi32> to vector<8x1xi32>
    %10 = vector.broadcast %9 : vector<8x1xi32> to vector<8x128xi32>
    %11 = arith.cmpi eq, %8, %10 : vector<8x128xi32>
    %12 = arith.extui %11 : vector<8x128xi1> to vector<8x128xi32>
    %13 = arith.sitofp %12 : vector<8x128xi32> to vector<8x128xf32>
    %14 = arith.truncf %13 : vector<8x128xf32> to vector<8x128xbf16>
    %15 = tpu.iota {dimensions = array<i32: 1>} : vector<8x128xi32>
    %16 = vector.extract_strided_slice %0 {offsets = [0, 2], sizes = [8, 1], strides = [1, 1]} : vector<8x3xi32> to vector<8x1xi32>
    %17 = vector.broadcast %16 : vector<8x1xi32> to vector<8x128xi32>
    %18 = arith.cmpi eq, %15, %17 : vector<8x128xi32>
    %19 = arith.extui %18 : vector<8x128xi1> to vector<8x128xi32>
    %20 = arith.sitofp %19 : vector<8x128xi32> to vector<8x128xf32>
    %21 = arith.truncf %20 : vector<8x128xf32> to vector<8x128xbf16>
    %22 = tpu.concatenate %7, %14, %21 in 1 : vector<8x128xbf16>, vector<8x128xbf16>, vector<8x128xbf16> -> vector<8x384xbf16>
    %c0_1 = arith.constant 0 : index
    %c0_2 = arith.constant 0 : index
    %23 = vector.load %arg2[%c0_1, %c0_2] : memref<384x128xbf16, #tpu.memory_space<vmem>>, vector<384x128xbf16>
    %cst = arith.constant dense<0.000000e+00> : vector<8x128xf32>
    %24 = tpu.matmul %22, %23, %cst {dimension_numbers = #tpu.dot_dimension_numbers<[1], [0], [0], [1], [0, 0, 1, 1], [], []>} : vector<8x384xbf16>, vector<384x128xbf16>, vector<8x128xf32> -> vector<8x128xf32>
    %cst_3 = arith.constant dense<0.000000e+00> : vector<8xf32>
    %25 = vector.multi_reduction <add>, %24, %cst_3 [1] : vector<8x128xf32> to vector<8xf32>
    %26 = vector.shape_cast %25 : vector<8xf32> to vector<8x1xf32>
    %cst_4 = arith.constant 7.812500e-03 : f32
    %27 = vector.broadcast %cst_4 : f32 to vector<8x1xf32>
    %28 = arith.mulf %26, %27 : vector<8x1xf32>
    %29 = vector.broadcast %28 : vector<8x1xf32> to vector<8x128xf32>
    %30 = arith.subf %24, %29 : vector<8x128xf32>
    %31 = arith.mulf %30, %30 : vector<8x128xf32>
    %cst_5 = arith.constant dense<0.000000e+00> : vector<8xf32>
    %32 = vector.multi_reduction <add>, %31, %cst_5 [1] : vector<8x128xf32> to vector<8xf32>
    %33 = vector.shape_cast %32 : vector<8xf32> to vector<8x1xf32>
    %cst_6 = arith.constant 0.000000e+00 : f32
    %34 = vector.broadcast %cst_6 : f32 to vector<8x1xf32>
    %35 = arith.mulf %34, %28 : vector<8x1xf32>
    %36 = arith.mulf %35, %28 : vector<8x1xf32>
    %37 = arith.subf %33, %36 : vector<8x1xf32>
    %cst_7 = arith.constant 7.812500e-03 : f32
    %38 = vector.broadcast %cst_7 : f32 to vector<8x1xf32>
    %39 = arith.mulf %37, %38 : vector<8x1xf32>
    %cst_8 = arith.constant 9.99999974E-6 : f32
    %40 = vector.broadcast %cst_8 : f32 to vector<8x1xf32>
    %41 = arith.addf %39, %40 : vector<8x1xf32>
    %42 = math.rsqrt %41 : vector<8x1xf32>
    %43 = vector.broadcast %42 : vector<8x1xf32> to vector<8x128xf32>
    %44 = arith.mulf %30, %43 : vector<8x128xf32>
    %c0_9 = arith.constant 0 : index
    %c0_10 = arith.constant 0 : index
    %45 = vector.load %arg3[%c0_9, %c0_10] : memref<1x128xf32, #tpu.memory_space<vmem>>, vector<1x128xf32>
    %46 = vector.broadcast %45 : vector<1x128xf32> to vector<8x128xf32>
    %47 = arith.mulf %44, %46 : vector<8x128xf32>
    %c0_11 = arith.constant 0 : index
    %c0_12 = arith.constant 0 : index
    %48 = vector.load %arg4[%c0_11, %c0_12] : memref<1x128xf32, #tpu.memory_space<vmem>>, vector<1x128xf32>
    %49 = vector.broadcast %48 : vector<1x128xf32> to vector<8x128xf32>
    %50 = arith.addf %47, %49 : vector<8x128xf32>
    %c0_13 = arith.constant 0 : index
    %c0_14 = arith.constant 0 : index
    %51 = vector.load %arg5[%c0_13, %c0_14] : memref<8x1xf32, #tpu.memory_space<vmem>>, vector<8x1xf32>
    %52 = vector.broadcast %51 : vector<8x1xf32> to vector<8x128xf32>
    %53 = arith.mulf %50, %52 : vector<8x128xf32>
    %c0_15 = arith.constant 0 : index
    %c0_16 = arith.constant 0 : index
    %54 = vector.load %arg6[%c0_15, %c0_16] : memref<8x128xf32, #tpu.memory_space<vmem>>, vector<8x128xf32>
    tpu.vector_store %arg6[%c0_15, %c0_16], %53 {strides = array<i32>} : memref<8x128xf32, #tpu.memory_space<vmem>>, vector<8x128xf32>,
    return
  }
  func.func @transform_0(%arg0: i32) -> (i32, i32) {
    %c0_i32 = arith.constant 0 : i32
    %c0_i32_0 = arith.constant 0 : i32
    return %arg0, %c0_i32 : i32, i32
  }
  func.func @transform_1(%arg0: i32) -> (i32, i32) {
    %c0_i32 = arith.constant 0 : i32
    %c0_i32_0 = arith.constant 0 : i32
    %c0_i32_1 = arith.constant 0 : i32
    return %c0_i32, %c0_i32_0 : i32, i32
  }
  func.func @transform_2(%arg0: i32) -> (i32, i32) {
    %c0_i32 = arith.constant 0 : i32
    %c0_i32_0 = arith.constant 0 : i32
    %c0_i32_1 = arith.constant 0 : i32
    return %c0_i32, %c0_i32_0 : i32, i32
  }
  func.func @transform_3(%arg0: i32) -> (i32, i32) {
    %c0_i32 = arith.constant 0 : i32
    %c0_i32_0 = arith.constant 0 : i32
    %c0_i32_1 = arith.constant 0 : i32
    return %c0_i32, %c0_i32_0 : i32, i32
  }
  func.func @transform_4(%arg0: i32) -> (i32, i32) {
    %c0_i32 = arith.constant 0 : i32
    %c0_i32_0 = arith.constant 0 : i32
    return %arg0, %c0_i32 : i32, i32
  }
  func.func @transform_5(%arg0: i32) -> (i32, i32) {
    %c0_i32 = arith.constant 0 : i32
    %c0_i32_0 = arith.constant 0 : i32
    return %arg0, %c0_i32 : i32, i32
  }
}

</mosaic_0001>

<bundles_post_ra>
// kernel: tpu_custom_call.1
= control target key start
LH: loop header
LB: loop body
LE: loop exit
PB: predicated region body
PF: predicated region fallthrough
CT: control target
= control target key end

     0   :  { %10 = vsyncpa [#allocation3], 0  ;;  %s1167_s0 = inlined_call_operand.vmem [shape: s32[16,3], index: 0, kind: input, shape index: {}]   ;;  %s1168_s1 = inlined_call_operand.hbm [shape: bf16[384,128], index: 1, kind: input, shape index: {}]   ;;  %s1169_s2 = inlined_call_operand.vmem [shape: f32[1,128], index: 2, kind: input, shape index: {}]   ;;  %s1170_s3 = inlined_call_operand.vmem [shape: f32[1,128], index: 3, kind: input, shape index: {}]   ;;  %s1171_s4 = inlined_call_operand.vmem [shape: f32[16,1], index: 4, kind: input, shape index: {}]   ;;  %s1172_s5 = inlined_call_operand.hbm [shape: f32[16,128], index: 5, kind: output, shape index: {}]  }
   0x1   :  { %11 = vsyncpa [#allocation4], 0 }
   0x2   :  { %13 = vsyncpa [#allocation4 + $0x1], 0  ;;  %s1007_s18 = smov 0   ;;  %s1009_s19 = smov 0  }
   0x3   :  { %s1011_s20 = smov 0   ;;  %s1013_s21 = smov 0  }
   0x4 LB: > { %s1028_s22 = sadd.s32 4294967295, %s965_s21   ;;  %s684_s23 = sadd.s32 4294967294, %s965_s21   ;;  %s965_s21 = sphi %s1013_s21, %s1188_s21   ;;  %s961_s20 = sphi %s1011_s20, %s1187_s20   ;;  %s957_s19 = sphi %s1009_s19, %s1186_s19   ;;  %s953_s18 = sphi %s1007_s18, %s1185_s18  }
   0x5   : > { %s1032_s24 = sadd.s32 1, %s965_s21   ;;  %s141_s25 = sadd.s32 1, %s961_s20 }
   0x6   : > { %s138_s26 = ssub.s32 %s965_s21, %s1032_s24  ;;  %p151_p0 = scmp.ne.s32.totalorder %s961_s20, %s957_s19 }
   0x7   : > { %p139_p1 = scmp.eq.s32.totalorder %s138_s26, 0  ;;  %p152_p2 = scmp.eq.s32.totalorder %s1028_s22, 1 }
   0x8   : > { %p157_p3 = scmp.ne.s32.totalorder %s957_s19, %s953_s18  ;;  %p158_p4 = scmp.eq.s32.totalorder %s684_s23, 1 }
   0x9   : > { %s1043_s27 = scalar_select %p139_p1, %s961_s20, %s141_s25  }
   0xa   : > { %p1045_p5 = por %p152_p2, %p151_p0  ;;  %p1049_p6 = por %p158_p4, %p157_p3 }
   0xb   : > { %p685_p7 = scmp.ge.s32.totalorder %s965_s21, 1  ;;  %p165_p8 = scmp.lt.s32.totalorder %s965_s21, 3 }
   0xc   : > { %s1176_s28 = scalar_select %p1045_p5, 1, 0 }
   0xd   : > { %s1177_s29 = scalar_select %p1049_p6, 1, 0 }
   0xe   : > { %p1173_p9 = scmp.eq.s32.totalorder %s1028_s22, 0  ;;  %p1056_p10 = pnand %p685_p7, %p165_p8 }
   0xf   : > { %s967_s6 = smov [#allocation2]   ;;  %s871_s11 = scalar_lea.hbm %s1168_s1, 3072 }
  0x10   : > { %s1178_s30 = scalar_select %p1056_p10, 1, 0 }
  0x11   : > { %s177_s7 = sshll.u32 %s967_s6, 4  ;;  %p789_p11 = pneg %p1056_p10  ;;  %s178_s7 = int_to_ptr.vmem [resolvable:$true] %s177_s7 }
  0x12   : > { %p872_p13 = scmp.ne.s32.totalorder %s1168_s1, %s871_s11  ;;  %p878_p3 = scmp.lt.u32.totalorder %s871_s11, %s1168_s1 }
  0x13   : > { %p1064_p12 = pnand %p1173_p9, %p789_p11 }
  0x15   : > { %p873_p0 = pneg %p1064_p12 }
  0x17   : > { %p874_p1 = pnand %p873_p0, %p872_p13 }
  0x19   : > { %p875_p2 = pneg %p874_p1 }
  0x1b   : > { %p880_p4 = pnand %p878_p3, %p875_p2 }
  0x1d   : > { %883 = shalt.err (!%p880_p4)
}
  0x1e   : > { %s884_s16 = scalar_lea.vmem %s178_s7, 3072  ;;  %p892_p9 = scmp.lt.s32.totalorder %s178_s7, %s178_s7 }
  0x1f   : > { %p885_p7 = scmp.ne.s32.totalorder %s178_s7, %s884_s16  ;;  %p893_p6 = scmp.lt.s32.totalorder %s884_s16, %s884_s16 }
  0x21   : > { %p887_p8 = pnand %p885_p7, %p873_p0  ;;  %p894_p5 = por %p893_p6, %p892_p9 }
  0x23   : > { %p888_p11 = pneg %p887_p8 }
  0x25   : > { %p895_p10 = pnand %p894_p5, %p888_p11 }
  0x27   : > { %898 = shalt.err (!%p895_p10)
}
  0x28   : > { %s968_s17 = smov 64   ;;  %s969_s23 = smov 4  }
  0x29   : > { %792 = dma.hbm_to_vmem [thread:$0]  (!%p1064_p12), %s1168_s1, 3072, %s178_s7, [#allocation3], %s968_s17, %s968_s17, %s969_s23  }
  0x2a   : > { %p1180_p13 = scmp.ne.s32.totalorder %s1178_s30, 0 }
  0x2b   : > { %p1181_p1 = scmp.eq.s32.totalorder (!%p1180_p13), %s1028_s22, 0 }
  0x2c   : > { %213 = sbr.rel (%p1180_p13) target bundleno = 740 (0x2e4), region = 40 }
  0x33   : > { %944 = dma.done.wait (%p1181_p1), [#allocation3], 3072   ;;  %p1182_p0 = pmov %p1181_p1 }
  0x34   : > { %p244_p5 = scmp.lt.s32.totalorder %s1028_s22, 1  ;;  %v970_v0 = vmov 1   ;;  %v971_v1 = vmov 2   ;;  %v972_v2 = vmov 0.0   ;;  %v845_v4 = vld [vmem:[#allocation2 + $0x40] sm:$0xff]   ;;  %v848_v7 = vld [vmem:[#allocation2 + $0x48] sm:$0xff]   ;;  %v254_v29 = vlaneseq }
  0x35   : > { %946 = vsyncadd (%p1182_p0), [#allocation3], 4294964224  ;;  %841 = vset.pattern.permute.xlu0 %v970_v0  ;;  %843 = vset.pattern.permute.xlu1 %v971_v1  ;;  %v846_v5 = vld [vmem:[#allocation2] sm:$0xff]   ;;  %v973_v8 = vmov 0   ;;  %v849_v9 = vld [vmem:[#allocation2 + $0x8] sm:$0xff]   ;;  %vm974_vm0 = vmmov 0  }
  0x36   : > { %s1092_s6 = scalar_select %p244_p5, %s1028_s22, 1  ;;  %763 = vmatprep.subr.bf16.mxu1 %v972_v2  ;;  %732 = vmatprep.subr.bf16.mxu0 %v845_v4  ;;  %v847_v6 = vld [vmem:[#allocation2 + $0x80] sm:$0xff]   ;;  %v850_v10 = vld [vmem:[#allocation2 + $0x88] sm:$0xff]   ;;  %v851_v11 = vld [vmem:[#allocation2 + $0x50] sm:$0xff]   ;;  %v255_v30 = vand.u32 127, %v254_v29 }
  0x37   : > { %733 = vmatpush3.bf16.msra.mxu0 %v846_v5  ;;  %764 = vmatpush3.bf16.msra.mxu1 %v847_v6  ;;  %v852_v12 = vld [vmem:[#allocation2 + $0x10] sm:$0xff]   ;;  %v854_v14 = vld [vmem:[#allocation2 + $0x58] sm:$0xff]   ;;  %v857_v17 = vld [vmem:[#allocation2 + $0x60] sm:$0xff]   ;;  %v975_v33 = vmov 1.0|1.0   ;;  %s241_s13 = sand.u32 1, %s957_s19  }
  0x38   : > { %s691_s30 = sshll.u32 %s1092_s6, 3  ;;  %734 = vmatprep.subr.bf16.mxu0 %v848_v7  ;;  %765 = vmatprep.subr.bf16.mxu1 %v972_v2  ;;  %v853_v13 = vld [vmem:[#allocation2 + $0x90] sm:$0xff]   ;;  %v855_v15 = vld [vmem:[#allocation2 + $0x18] sm:$0xff]   ;;  %v858_v18 = vld [vmem:[#allocation2 + $0x20] sm:$0xff]   ;;  %s690_s14 = sshll.u32 %s241_s13, 3 }
  0x39   : > { %s247_s9 = scalar_lea.vmem %s1167_s0, %s691_s30  ;;  %779 = vmatprep.mubr.msk.bf16.mxu1 %vm974_vm0, %v972_v2  ;;  %v856_v16 = vld [vmem:[#allocation2 + $0x98] sm:$0xff]   ;;  %v859_v19 = vld [vmem:[#allocation2 + $0xa0] sm:$0xff]   ;;  %v860_v20 = vld [vmem:[#allocation2 + $0x68] sm:$0xff]   ;;  %s251_s12 = scalar_lea.vmem %s1171_s4, %s691_s30 }
  0x3a   : > { %v253_v3 = vld [vmem:[%s247_s9] sm:$0xff]  ;;  %v861_v21 = vld [vmem:[#allocation2 + $0x28] sm:$0xff]   ;;  %v866_v26 = vld [vmem:[#allocation2 + $0x78] sm:$0xff]   ;;  %s729_s25 = sshll.u32 %s1028_s22, 7  ;;  %s243_s26 = scalar_lea.vmem [#allocation5], %s690_s14 }
  0x3b   : > { %264 = vperm.xlu0 %841, %v253_v3   ;;  %271 = vperm.xlu1 %843, %v253_v3   ;;  %v862_v22 = vld [vmem:[#allocation2 + $0xa8] sm:$0xff]   ;;  %v863_v23 = vld [vmem:[#allocation2 + $0x70] sm:$0xff]   ;;  %v867_v27 = vld [vmem:[#allocation2 + $0x38] sm:$0xff]   ;;  %s601_s6 = sshll.u32 %s243_s26, 4  ;;  %s1125_s8 = scalar_lea.hbm %s1172_s5, %s729_s25  ;;  %s1127_s6 = int_to_ptr.vmem [resolvable:$true] %s601_s6 }
  0x3c   : > { %735 = vmatpush3.bf16.msra.mxu0 %v849_v9  ;;  %766 = vmatpush3.bf16.msra.mxu1 %v850_v10  ;;  %v864_v24 = vld [vmem:[#allocation2 + $0x30] sm:$0xff]   ;;  %v868_v28 = vld [vmem:[#allocation2 + $0xb8] sm:$0xff]   ;;  %s588_s9 = scalar_lea.sflag [#allocation4], %s241_s13  ;;  %s899_s10 = scalar_lea.vmem %s1127_s6, 128 }
  0x3d   : > { %736 = vmatprep.subr.bf16.mxu0 %v851_v11  ;;  %767 = vmatprep.subr.bf16.mxu1 %v972_v2  ;;  %v865_v25 = vld [vmem:[#allocation2 + $0xb0] sm:$0xff]   ;;  %p900_p6 = scmp.ne.s32.totalorder %s1127_s6, %s899_s10  ;;  %p1183_p9 = scmp.ne.s32.totalorder %s1176_s28, 0 }
  0x3e   : > { %v579_v45 = vld [vmem:[%s251_s12] sm:$0xff]  ;;  %s976_s22 = smov [#allocation5]  }
  0x3f   : > { %842 = vset.pattern.permute.xlu0 %v973_v8  ;;  %844 = vset.pattern.permute.xlu1 %v973_v8  ;;  %v726_v57 = vld [vmem:[%s1169_s2] ss:$0 sm:$0xff]  ;;  %p901_p10 = pnand %p900_p6, %p1183_p9  ;;  %s903_s11 = sshll.u32 %s976_s22, 4  ;;  %s904_s11 = int_to_ptr.vmem [resolvable:$false] %s903_s11 }
  0x40   : > { %257 = vperm.xlu0 %842, %v253_v3   ;;  %737 = vmatpush3.bf16.msra.mxu0 %v852_v12  ;;  %v727_v59 = vld [vmem:[%s1170_s3] ss:$0 sm:$0xff]  ;;  %s905_s12 = scalar_lea.vmem %s904_s11, 256  ;;  %p906_p2 = scmp.lt.s32.totalorder %s1127_s6, %s904_s11 }
  0x41   : > { %768 = vmatpush3.bf16.msra.mxu1 %v853_v13  ;;  %738 = vmatprep.subr.bf16.mxu0 %v854_v14  ;;  %p902_p12 = pneg %p901_p10  ;;  %p907_p3 = scmp.lt.s32.totalorder %s905_s12, %s899_s10 }
  0x42   : > { %769 = vmatprep.subr.bf16.mxu1 %v972_v2 }
  0x43   : > { %p908_p4 = por %p907_p3, %p906_p2 }
  0x44   : > { %739 = vmatpush3.bf16.msra.mxu0 %v855_v15 }
  0x45   : > { %770 = vmatpush3.bf16.msra.mxu1 %v856_v16  ;;  %740 = vmatprep.subr.bf16.mxu0 %v857_v17  ;;  %p909_p7 = pnand %p908_p4, %p902_p12 }
  0x46   : > { %771 = vmatprep.subr.bf16.mxu1 %v972_v2 }
  0x48   : > { %741 = vmatpush3.bf16.msra.mxu0 %v858_v18 }
  0x49   : > { %772 = vmatpush3.bf16.msra.mxu1 %v859_v19  ;;  %742 = vmatprep.subr.bf16.mxu0 %v860_v20 }
  0x4a   : > { %773 = vmatprep.subr.bf16.mxu1 %v972_v2 }
  0x4c   : > { %743 = vmatpush3.bf16.msra.mxu0 %v861_v21 }
  0x4d   : > { %774 = vmatpush3.bf16.msra.mxu1 %v862_v22  ;;  %744 = vmatprep.subr.bf16.mxu0 %v863_v23 }
  0x4e   : > { %775 = vmatprep.subr.bf16.mxu1 %v972_v2 }
  0x50   : > { %745 = vmatpush3.bf16.msra.mxu0 %v864_v24 }
  0x51   : > { %776 = vmatpush3.bf16.msra.mxu1 %v865_v25  ;;  %746 = vmatprep.subr.bf16.mxu0 %v866_v26 }
  0x52   : > { %777 = vmatprep.subr.bf16.mxu1 %v972_v2 }
  0x54   : > { %747 = vmatpush3.bf16.msra.mxu0 %v867_v27 }
  0x55   : > { %778 = vmatpush3.bf16.msra.mxu1 %v868_v28 }
  0xba   : > { %v265_v31 = vpop.permute.xlu0 %264  ;;  %v272_v32 = vpop.permute.xlu1 %271 }
  0xbb   : > { %vm266_vm1 = vcmp.eq.s32.totalorder %v255_v30, %v265_v31  ;;  %vm273_vm2 = vcmp.eq.s32.totalorder %v255_v30, %v272_v32 }
  0xbc   : > { %vm720_vm3 = vmpackc.low %vm266_vm1, %vm266_vm1 }
  0xbd   : > { %721 = vmatprep.mubr.msk.bf16.mxu0 %vm720_vm3, %v975_v33  ;;  %vm724_vm4 = vmpackc.low %vm273_vm2, %vm273_vm2 }
  0xbe   : > { %780 = vmatmul.mubr.msk.bf16.vlgmr.msra.gmra.mrb[0].mxu1 %vm724_vm4, %v975_v33 }
  0xbf   : > { %v258_v34 = vpop.permute.xlu0 %257 }
  0xc0   : > { %vm259_vm5 = vcmp.eq.s32.totalorder %v255_v30, %v258_v34 }
  0xc1   : > { %vm722_vm6 = vmpackc.low %vm259_vm5, %vm259_vm5 }
  0xc2   : > { %723 = vmatmul.mubr.msk.bf16.vlgmr.msra.gmra.mrb[0].mxu0 %vm722_vm6, %v975_v33 }
 0x191   : > { %v543_v35 = vpop.f32.mrb[0].mxu1 }
 0x192   : > { %v781_v36 = vpop.f32.mrb[1].mxu1 }
 0x193   : > { %v546_v37 = vpop.f32.mrb[2].mxu1 }
 0x194   : > { %v782_v38 = vpop.f32.mrb[3].mxu1 }
 0x195   : > { %v748_v39 = vpop.f32.mrb[0].mxu0 }
 0x196   : > { %v749_v40 = vpop.f32.mrb[1].mxu0 }
 0x197   : > { %v750_v41 = vadd.f32 %v749_v40, %v748_v39  ;;  %v751_v42 = vpop.f32.mrb[2].mxu0 }
 0x198   : > { %v752_v43 = vpop.f32.mrb[3].mxu0 }
 0x199   : > { %v544_v44 = vadd.f32 %v750_v41, %v543_v35 }
 0x19b   : > { %549 = vadd.xlane.f32.xlu1 %v544_v44 }
 0x1ac   : > { %582 = vperm.xlu1 %844, %v579_v45  }
 0x228   : > { %v550_v46 = vpop.xlane.xlu1 %549 }
 0x229   : > { %v551_v47 = vmul.f32 0.0078125, %v550_v46 }
 0x22b   : > { %v552_v48 = vsub.f32 %v544_v44, %v551_v47  ;;  %v556_v50 = vmul.f32 0.0, %v551_v47 }
 0x22c   : > { %v583_v61 = vpop.permute.xlu1 %582 }
 0x22d   : > { %v553_v49 = vmul.f32 %v552_v48, %v552_v48  ;;  %v557_v51 = vmul.f32 %v556_v50, %v551_v47 }
 0x22f   : > { %554 = vadd.xlane.f32.xlu0 %v553_v49 }
 0x2bc   : > { %v555_v52 = vpop.xlane.xlu0 %554 }
 0x2bd   : > { %v558_v53 = vsub.f32 %v555_v52, %v557_v51 }
 0x2bf   : > { %v559_v54 = vmul.f32 0.0078125, %v558_v53 }
 0x2c1   : > { %v560_v55 = vadd.f32 1e-05, %v559_v54 }
 0x2c3   : > { %869 = vrsqrt.f32 %v560_v55 }
 0x2cd   : > { %v870_v56 = vpop.eup %869 }
 0x2ce   : > { %v562_v58 = vmul.f32 %v870_v56, %v552_v48 }
 0x2d0   : > { %v570_v60 = vmul.f32 %v726_v57, %v562_v58 }
 0x2d2   : > { %v578_v62 = vadd.f32 %v727_v59, %v570_v60 }
 0x2d4   : > { %v585_v63 = vmul.f32 %v583_v61, %v578_v62 }
 0x2d6   : > { %586 = vst [vmem:[%s243_s26] sm:$0xff] %v585_v63 }
 0x2d7   : > { %912 = shalt.err (!%p909_p7)
}
 0x2d8   : > { %s913_s13 = scalar_lea.hbm %s1125_s8, 128  ;;  %s917_s16 = scalar_lea.hbm %s1172_s5, 256 }
 0x2d9   : > { %p914_p8 = scmp.ne.s32.totalorder %s1125_s8, %s913_s13  ;;  %p918_p1 = scmp.lt.u32.totalorder %s1125_s8, %s1172_s5 }
 0x2da   : > { %p919_p0 = scmp.lt.u32.totalorder %s917_s16, %s913_s13  ;;  %p921_p6 = scmp.lt.u32.totalorder %s913_s13, %s1125_s8 }
 0x2db   : > { %p915_p11 = pnand %p914_p8, %p1183_p9 }
 0x2dc   : > { %p920_p5 = por %p919_p0, %p918_p1 }
 0x2dd   : > { %p916_p13 = pneg %p915_p11 }
 0x2de   : > { %p922_p10 = por %p921_p6, %p920_p5 }
 0x2e0   : > { %p923_p12 = pnand %p922_p10, %p916_p13 }
 0x2e2   : > { %926 = shalt.err (!%p923_p12)
}
 0x2e3   : > { %787 = dma.vmem_to_hbm [thread:$0]  (%p1183_p9), %s1127_s6, 128, %s1125_s8, %s588_s9  }
 0x2e4 PF: > { %p799_p2 = scmp.ge.s32.totalorder %s965_s21, 2  ;;  %s613_s25 = sand.u32 1, %s953_s18  }
 0x2e5   : > { %p1184_p3 = scmp.ne.s32.totalorder %s1177_s29, 0  ;;  %s614_s26 = scalar_lea.sflag [#allocation4], %s613_s25 }
 0x2e7   : > { %p794_p4 = pnand %p799_p2, %p1184_p3 }
 0x2e9   : > { %948 = dma.done.wait (!%p794_p4), %s614_s26, 128  }
 0x2ea   : > { %950 = vsyncadd (!%p794_p4), %s614_s26, 4294967168  ;;  %p16_p7 = scmp.ge.s32.totalorder %s1032_s24, 4   ;;  %s1185_s18 = smov %s957_s19 }
 0x2eb   : > { %s1186_s19 = smov %s961_s20  ;;  %s1187_s20 = smov %s1043_s27 }
 0x2ec   : > { %s1188_s21 = smov %s1032_s24  ;;  %18 = sbr.rel (!%p16_p7) target bundleno = 4 (0x4), region = 83 }
 0x2f3   :  { %619 = vsyncpa [#allocation3], 1 }
 0x2f4   :  { %621 = vsyncpa [#allocation3 + $0x1], 1 }
 0x2f5   :  { %622 = vsyncpa [#allocation4], 1 }
 0x2f6   :  { %624 = vsyncpa [#allocation4 + $0x1], 1 }

// kernel: tpu_custom_call.1
= control target key start
LH: loop header
LB: loop body
LE: loop exit
PB: predicated region body
PF: predicated region fallthrough
CT: control target
= control target key end

     0   :  { %10 = vsyncpa [#allocation3], 0  ;;  %s1167_s0 = inlined_call_operand.vmem [shape: s32[16,3], index: 0, kind: input, shape index: {}]   ;;  %s1168_s1 = inlined_call_operand.hbm [shape: bf16[384,128], index: 1, kind: input, shape index: {}]   ;;  %s1169_s2 = inlined_call_operand.vmem [shape: f32[1,128], index: 2, kind: input, shape index: {}]   ;;  %s1170_s3 = inlined_call_operand.vmem [shape: f32[1,128], index: 3, kind: input, shape index: {}]   ;;  %s1171_s4 = inlined_call_operand.vmem [shape: f32[16,1], index: 4, kind: input, shape index: {}]   ;;  %s1172_s5 = inlined_call_operand.hbm [shape: f32[16,128], index: 5, kind: output, shape index: {}]  }
   0x1   :  { %11 = vsyncpa [#allocation4], 0 }
   0x2   :  { %13 = vsyncpa [#allocation4 + $0x1], 0  ;;  %s1007_s18 = smov 0   ;;  %s1009_s19 = smov 0  }
   0x3   :  { %s1011_s20 = smov 0   ;;  %s1013_s21 = smov 0  }
   0x4 LB: > { %s1028_s22 = sadd.s32 4294967295, %s965_s21   ;;  %s684_s23 = sadd.s32 4294967294, %s965_s21   ;;  %s965_s21 = sphi %s1013_s21, %s1188_s21   ;;  %s961_s20 = sphi %s1011_s20, %s1187_s20   ;;  %s957_s19 = sphi %s1009_s19, %s1186_s19   ;;  %s953_s18 = sphi %s1007_s18, %s1185_s18  }
   0x5   : > { %s1032_s24 = sadd.s32 1, %s965_s21   ;;  %s141_s25 = sadd.s32 1, %s961_s20 }
   0x6   : > { %s138_s26 = ssub.s32 %s965_s21, %s1032_s24  ;;  %p151_p0 = scmp.ne.s32.totalorder %s961_s20, %s957_s19 }
   0x7   : > { %p139_p1 = scmp.eq.s32.totalorder %s138_s26, 0  ;;  %p152_p2 = scmp.eq.s32.totalorder %s1028_s22, 1 }
   0x8   : > { %p157_p3 = scmp.ne.s32.totalorder %s957_s19, %s953_s18  ;;  %p158_p4 = scmp.eq.s32.totalorder %s684_s23, 1 }
   0x9   : > { %s1043_s27 = scalar_select %p139_p1, %s961_s20, %s141_s25  }
   0xa   : > { %p1045_p5 = por %p152_p2, %p151_p0  ;;  %p1049_p6 = por %p158_p4, %p157_p3 }
   0xb   : > { %p685_p7 = scmp.ge.s32.totalorder %s965_s21, 1  ;;  %p165_p8 = scmp.lt.s32.totalorder %s965_s21, 3 }
   0xc   : > { %s1176_s28 = scalar_select %p1045_p5, 1, 0 }
   0xd   : > { %s1177_s29 = scalar_select %p1049_p6, 1, 0 }
   0xe   : > { %p1173_p9 = scmp.eq.s32.totalorder %s1028_s22, 0  ;;  %p1056_p10 = pnand %p685_p7, %p165_p8 }
   0xf   : > { %s967_s6 = smov [#allocation2]   ;;  %s871_s11 = scalar_lea.hbm %s1168_s1, 3072 }
  0x10   : > { %s1178_s30 = scalar_select %p1056_p10, 1, 0 }
  0x11   : > { %s177_s7 = sshll.u32 %s967_s6, 4  ;;  %p789_p11 = pneg %p1056_p10  ;;  %s178_s7 = int_to_ptr.vmem [resolvable:$true] %s177_s7 }
  0x12   : > { %p872_p13 = scmp.ne.s32.totalorder %s1168_s1, %s871_s11  ;;  %p878_p3 = scmp.lt.u32.totalorder %s871_s11, %s1168_s1 }
  0x13   : > { %p1064_p12 = pnand %p1173_p9, %p789_p11 }
  0x15   : > { %p873_p0 = pneg %p1064_p12 }
  0x17   : > { %p874_p1 = pnand %p873_p0, %p872_p13 }
  0x19   : > { %p875_p2 = pneg %p874_p1 }
  0x1b   : > { %p880_p4 = pnand %p878_p3, %p875_p2 }
  0x1d   : > { %883 = shalt.err (!%p880_p4)
}
  0x1e   : > { %s884_s16 = scalar_lea.vmem %s178_s7, 3072  ;;  %p892_p9 = scmp.lt.s32.totalorder %s178_s7, %s178_s7 }
  0x1f   : > { %p885_p7 = scmp.ne.s32.totalorder %s178_s7, %s884_s16  ;;  %p893_p6 = scmp.lt.s32.totalorder %s884_s16, %s884_s16 }
  0x21   : > { %p887_p8 = pnand %p885_p7, %p873_p0  ;;  %p894_p5 = por %p893_p6, %p892_p9 }
  0x23   : > { %p888_p11 = pneg %p887_p8 }
  0x25   : > { %p895_p10 = pnand %p894_p5, %p888_p11 }
  0x27   : > { %898 = shalt.err (!%p895_p10)
}
  0x28   : > { %s968_s17 = smov 64   ;;  %s969_s23 = smov 4  }
  0x29   : > { %792 = dma.hbm_to_vmem [thread:$0]  (!%p1064_p12), %s1168_s1, 3072, %s178_s7, [#allocation3], %s968_s17, %s968_s17, %s969_s23  }
  0x2a   : > { %p1180_p13 = scmp.ne.s32.totalorder %s1178_s30, 0 }
  0x2b   : > { %p1181_p1 = scmp.eq.s32.totalorder (!%p1180_p13), %s1028_s22, 0 }
  0x2c   : > { %213 = sbr.rel (%p1180_p13) target bundleno = 740 (0x2e4), region = 40 }
  0x33   : > { %944 = dma.done.wait (%p1181_p1), [#allocation3], 3072   ;;  %p1182_p0 = pmov %p1181_p1 }
  0x34   : > { %p244_p5 = scmp.lt.s32.totalorder %s1028_s22, 1  ;;  %v970_v0 = vmov 1   ;;  %v971_v1 = vmov 2   ;;  %v972_v2 = vmov 0.0   ;;  %v845_v4 = vld [vmem:[#allocation2 + $0x40] sm:$0xff]   ;;  %v848_v7 = vld [vmem:[#allocation2 + $0x48] sm:$0xff]   ;;  %v254_v29 = vlaneseq }
  0x35   : > { %946 = vsyncadd (%p1182_p0), [#allocation3], 4294964224  ;;  %841 = vset.pattern.permute.xlu0 %v970_v0  ;;  %843 = vset.pattern.permute.xlu1 %v971_v1  ;;  %v846_v5 = vld [vmem:[#allocation2] sm:$0xff]   ;;  %v973_v8 = vmov 0   ;;  %v849_v9 = vld [vmem:[#allocation2 + $0x8] sm:$0xff]   ;;  %vm974_vm0 = vmmov 0  }
  0x36   : > { %s1092_s6 = scalar_select %p244_p5, %s1028_s22, 1  ;;  %763 = vmatprep.subr.bf16.mxu1 %v972_v2  ;;  %732 = vmatprep.subr.bf16.mxu0 %v845_v4  ;;  %v847_v6 = vld [vmem:[#allocation2 + $0x80] sm:$0xff]   ;;  %v850_v10 = vld [vmem:[#allocation2 + $0x88] sm:$0xff]   ;;  %v851_v11 = vld [vmem:[#allocation2 + $0x50] sm:$0xff]   ;;  %v255_v30 = vand.u32 127, %v254_v29 }
  0x37   : > { %733 = vmatpush3.bf16.msra.mxu0 %v846_v5  ;;  %764 = vmatpush3.bf16.msra.mxu1 %v847_v6  ;;  %v852_v12 = vld [vmem:[#allocation2 + $0x10] sm:$0xff]   ;;  %v854_v14 = vld [vmem:[#allocation2 + $0x58] sm:$0xff]   ;;  %v857_v17 = vld [vmem:[#allocation2 + $0x60] sm:$0xff]   ;;  %v975_v33 = vmov 1.0|1.0   ;;  %s241_s13 = sand.u32 1, %s957_s19  }
  0x38   : > { %s691_s30 = sshll.u32 %s1092_s6, 3  ;;  %734 = vmatprep.subr.bf16.mxu0 %v848_v7  ;;  %765 = vmatprep.subr.bf16.mxu1 %v972_v2  ;;  %v853_v13 = vld [vmem:[#allocation2 + $0x90] sm:$0xff]   ;;  %v855_v15 = vld [vmem:[#allocation2 + $0x18] sm:$0xff]   ;;  %v858_v18 = vld [vmem:[#allocation2 + $0x20] sm:$0xff]   ;;  %s690_s14 = sshll.u32 %s241_s13, 3 }
  0x39   : > { %s247_s9 = scalar_lea.vmem %s1167_s0, %s691_s30  ;;  %779 = vmatprep.mubr.msk.bf16.mxu1 %vm974_vm0, %v972_v2  ;;  %v856_v16 = vld [vmem:[#allocation2 + $0x98] sm:$0xff]   ;;  %v859_v19 = vld [vmem:[#allocation2 + $0xa0] sm:$0xff]   ;;  %v860_v20 = vld [vmem:[#allocation2 + $0x68] sm:$0xff]   ;;  %s251_s12 = scalar_lea.vmem %s1171_s4, %s691_s30 }
  0x3a   : > { %v253_v3 = vld [vmem:[%s247_s9] sm:$0xff]  ;;  %v861_v21 = vld [vmem:[#allocation2 + $0x28] sm:$0xff]   ;;  %v866_v26 = vld [vmem:[#allocation2 + $0x78] sm:$0xff]   ;;  %s729_s25 = sshll.u32 %s1028_s22, 7  ;;  %s243_s26 = scalar_lea.vmem [#allocation5], %s690_s14 }
  0x3b   : > { %264 = vperm.xlu0 %841, %v253_v3   ;;  %271 = vperm.xlu1 %843, %v253_v3   ;;  %v862_v22 = vld [vmem:[#allocation2 + $0xa8] sm:$0xff]   ;;  %v863_v23 = vld [vmem:[#allocation2 + $0x70] sm:$0xff]   ;;  %v867_v27 = vld [vmem:[#allocation2 + $0x38] sm:$0xff]   ;;  %s601_s6 = sshll.u32 %s243_s26, 4  ;;  %s1125_s8 = scalar_lea.hbm %s1172_s5, %s729_s25  ;;  %s1127_s6 = int_to_ptr.vmem [resolvable:$true] %s601_s6 }
  0x3c   : > { %735 = vmatpush3.bf16.msra.mxu0 %v849_v9  ;;  %766 = vmatpush3.bf16.msra.mxu1 %v850_v10  ;;  %v864_v24 = vld [vmem:[#allocation2 + $0x30] sm:$0xff]   ;;  %v868_v28 = vld [vmem:[#allocation2 + $0xb8] sm:$0xff]   ;;  %s588_s9 = scalar_lea.sflag [#allocation4], %s241_s13  ;;  %s899_s10 = scalar_lea.vmem %s1127_s6, 128 }
  0x3d   : > { %736 = vmatprep.subr.bf16.mxu0 %v851_v11  ;;  %767 = vmatprep.subr.bf16.mxu1 %v972_v2  ;;  %v865_v25 = vld [vmem:[#allocation2 + $0xb0] sm:$0xff]   ;;  %p900_p6 = scmp.ne.s32.totalorder %s1127_s6, %s899_s10  ;;  %p1183_p9 = scmp.ne.s32.totalorder %s1176_s28, 0 }
  0x3e   : > { %v579_v45 = vld [vmem:[%s251_s12] sm:$0xff]  ;;  %s976_s22 = smov [#allocation5]  }
  0x3f   : > { %842 = vset.pattern.permute.xlu0 %v973_v8  ;;  %844 = vset.pattern.permute.xlu1 %v973_v8  ;;  %v726_v57 = vld [vmem:[%s1169_s2] ss:$0 sm:$0xff]  ;;  %p901_p10 = pnand %p900_p6, %p1183_p9  ;;  %s903_s11 = sshll.u32 %s976_s22, 4  ;;  %s904_s11 = int_to_ptr.vmem [resolvable:$false] %s903_s11 }
  0x40   : > { %257 = vperm.xlu0 %842, %v253_v3   ;;  %737 = vmatpush3.bf16.msra.mxu0 %v852_v12  ;;  %v727_v59 = vld [vmem:[%s1170_s3] ss:$0 sm:$0xff]  ;;  %s905_s12 = scalar_lea.vmem %s904_s11, 256  ;;  %p906_p2 = scmp.lt.s32.totalorder %s1127_s6, %s904_s11 }
  0x41   : > { %768 = vmatpush3.bf16.msra.mxu1 %v853_v13  ;;  %738 = vmatprep.subr.bf16.mxu0 %v854_v14  ;;  %p902_p12 = pneg %p901_p10  ;;  %p907_p3 = scmp.lt.s32.totalorder %s905_s12, %s899_s10 }
  0x42   : > { %769 = vmatprep.subr.bf16.mxu1 %v972_v2 }
  0x43   : > { %p908_p4 = por %p907_p3, %p906_p2 }
  0x44   : > { %739 = vmatpush3.bf16.msra.mxu0 %v855_v15 }
  0x45   : > { %770 = vmatpush3.bf16.msra.mxu1 %v856_v16  ;;  %740 = vmatprep.subr.bf16.mxu0 %v857_v17  ;;  %p909_p7 = pnand %p908_p4, %p902_p12 }
  0x46   : > { %771 = vmatprep.subr.bf16.mxu1 %v972_v2 }
  0x48   : > { %741 = vmatpush3.bf16.msra.mxu0 %v858_v18 }
  0x49   : > { %772 = vmatpush3.bf16.msra.mxu1 %v859_v19  ;;  %742 = vmatprep.subr.bf16.mxu0 %v860_v20 }
  0x4a   : > { %773 = vmatprep.subr.bf16.mxu1 %v972_v2 }
  0x4c   : > { %743 = vmatpush3.bf16.msra.mxu0 %v861_v21 }
  0x4d   : > { %774 = vmatpush3.bf16.msra.mxu1 %v862_v22  ;;  %744 = vmatprep.subr.bf16.mxu0 %v863_v23 }
  0x4e   : > { %775 = vmatprep.subr.bf16.mxu1 %v972_v2 }
  0x50   : > { %745 = vmatpush3.bf16.msra.mxu0 %v864_v24 }
  0x51   : > { %776 = vmatpush3.bf16.msra.mxu1 %v865_v25  ;;  %746 = vmatprep.subr.bf16.mxu0 %v866_v26 }
  0x52   : > { %777 = vmatprep.subr.bf16.mxu1 %v972_v2 }
  0x54   : > { %747 = vmatpush3.bf16.msra.mxu0 %v867_v27 }
  0x55   : > { %778 = vmatpush3.bf16.msra.mxu1 %v868_v28 }
  0xba   : > { %v265_v31 = vpop.permute.xlu0 %264  ;;  %v272_v32 = vpop.permute.xlu1 %271 }
  0xbb   : > { %vm266_vm1 = vcmp.eq.s32.totalorder %v255_v30, %v265_v31  ;;  %vm273_vm2 = vcmp.eq.s32.totalorder %v255_v30, %v272_v32 }
  0xbc   : > { %vm720_vm3 = vmpackc.low %vm266_vm1, %vm266_vm1 }
  0xbd   : > { %721 = vmatprep.mubr.msk.bf16.mxu0 %vm720_vm3, %v975_v33  ;;  %vm724_vm4 = vmpackc.low %vm273_vm2, %vm273_vm2 }
  0xbe   : > { %780 = vmatmul.mubr.msk.bf16.vlgmr.msra.gmra.mrb[0].mxu1 %vm724_vm4, %v975_v33 }
  0xbf   : > { %v258_v34 = vpop.permute.xlu0 %257 }
  0xc0   : > { %vm259_vm5 = vcmp.eq.s32.totalorder %v255_v30, %v258_v34 }
  0xc1   : > { %vm722_vm6 = vmpackc.low %vm259_vm5, %vm259_vm5 }
  0xc2   : > { %723 = vmatmul.mubr.msk.bf16.vlgmr.msra.gmra.mrb[0].mxu0 %vm722_vm6, %v975_v33 }
 0x191   : > { %v543_v35 = vpop.f32.mrb[0].mxu1 }
 0x192   : > { %v781_v36 = vpop.f32.mrb[1].mxu1 }
 0x193   : > { %v546_v37 = vpop.f32.mrb[2].mxu1 }
 0x194   : > { %v782_v38 = vpop.f32.mrb[3].mxu1 }
 0x195   : > { %v748_v39 = vpop.f32.mrb[0].mxu0 }
 0x196   : > { %v749_v40 = vpop.f32.mrb[1].mxu0 }
 0x197   : > { %v750_v41 = vadd.f32 %v749_v40, %v748_v39  ;;  %v751_v42 = vpop.f32.mrb[2].mxu0 }
 0x198   : > { %v752_v43 = vpop.f32.mrb[3].mxu0 }
 0x199   : > { %v544_v44 = vadd.f32 %v750_v41, %v543_v35 }
 0x19b   : > { %549 = vadd.xlane.f32.xlu1 %v544_v44 }
 0x1ac   : > { %582 = vperm.xlu1 %844, %v579_v45  }
 0x228   : > { %v550_v46 = vpop.xlane.xlu1 %549 }
 0x229   : > { %v551_v47 = vmul.f32 0.0078125, %v550_v46 }
 0x22b   : > { %v552_v48 = vsub.f32 %v544_v44, %v551_v47  ;;  %v556_v50 = vmul.f32 0.0, %v551_v47 }
 0x22c   : > { %v583_v61 = vpop.permute.xlu1 %582 }
 0x22d   : > { %v553_v49 = vmul.f32 %v552_v48, %v552_v48  ;;  %v557_v51 = vmul.f32 %v556_v50, %v551_v47 }
 0x22f   : > { %554 = vadd.xlane.f32.xlu0 %v553_v49 }
 0x2bc   : > { %v555_v52 = vpop.xlane.xlu0 %554 }
 0x2bd   : > { %v558_v53 = vsub.f32 %v555_v52, %v557_v51 }
 0x2bf   : > { %v559_v54 = vmul.f32 0.0078125, %v558_v53 }
 0x2c1   : > { %v560_v55 = vadd.f32 1e-05, %v559_v54 }
 0x2c3   : > { %869 = vrsqrt.f32 %v560_v55 }
 0x2cd   : > { %v870_v56 = vpop.eup %869 }
 0x2ce   : > { %v562_v58 = vmul.f32 %v870_v56, %v552_v48 }
 0x2d0   : > { %v570_v60 = vmul.f32 %v726_v57, %v562_v58 }
 0x2d2   : > { %v578_v62 = vadd.f32 %v727_v59, %v570_v60 }
 0x2d4   : > { %v585_v63 = vmul.f32 %v583_v61, %v578_v62 }
 0x2d6   : > { %586 = vst [vmem:[%s243_s26] sm:$0xff] %v585_v63 }
 0x2d7   : > { %912 = shalt.err (!%p909_p7)
}
 0x2d8   : > { %s913_s13 = scalar_lea.hbm %s1125_s8, 128  ;;  %s917_s16 = scalar_lea.hbm %s1172_s5, 256 }
 0x2d9   : > { %p914_p8 = scmp.ne.s32.totalorder %s1125_s8, %s913_s13  ;;  %p918_p1 = scmp.lt.u32.totalorder %s1125_s8, %s1172_s5 }
 0x2da   : > { %p919_p0 = scmp.lt.u32.totalorder %s917_s16, %s913_s13  ;;  %p921_p6 = scmp.lt.u32.totalorder %s913_s13, %s1125_s8 }
 0x2db   : > { %p915_p11 = pnand %p914_p8, %p1183_p9 }
 0x2dc   : > { %p920_p5 = por %p919_p0, %p918_p1 }
 0x2dd   : > { %p916_p13 = pneg %p915_p11 }
 0x2de   : > { %p922_p10 = por %p921_p6, %p920_p5 }
 0x2e0   : > { %p923_p12 = pnand %p922_p10, %p916_p13 }
 0x2e2   : > { %926 = shalt.err (!%p923_p12)
}
 0x2e3   : > { %787 = dma.vmem_to_hbm [thread:$0]  (%p1183_p9), %s1127_s6, 128, %s1125_s8, %s588_s9  }
 0x2e4 PF: > { %p799_p2 = scmp.ge.s32.totalorder %s965_s21, 2  ;;  %s613_s25 = sand.u32 1, %s953_s18  }
 0x2e5   : > { %p1184_p3 = scmp.ne.s32.totalorder %s1177_s29, 0  ;;  %s614_s26 = scalar_lea.sflag [#allocation4], %s613_s25 }
 0x2e7   : > { %p794_p4 = pnand %p799_p2, %p1184_p3 }
 0x2e9   : > { %948 = dma.done.wait (!%p794_p4), %s614_s26, 128  }
 0x2ea   : > { %950 = vsyncadd (!%p794_p4), %s614_s26, 4294967168  ;;  %p16_p7 = scmp.ge.s32.totalorder %s1032_s24, 4   ;;  %s1185_s18 = smov %s957_s19 }
 0x2eb   : > { %s1186_s19 = smov %s961_s20  ;;  %s1187_s20 = smov %s1043_s27 }
 0x2ec   : > { %s1188_s21 = smov %s1032_s24  ;;  %18 = sbr.rel (!%p16_p7) target bundleno = 4 (0x4), region = 83 }
 0x2f3   :  { %619 = vsyncpa [#allocation3], 1 }
 0x2f4   :  { %621 = vsyncpa [#allocation3 + $0x1], 1 }
 0x2f5   :  { %622 = vsyncpa [#allocation4], 1 }
 0x2f6   :  { %624 = vsyncpa [#allocation4 + $0x1], 1 }

</bundles_post_ra>
